<compile_context>
chip_gen: v7x
topology: tpu7x:2x2x1
jax: 0.10.0
libtpu: 0.0.40
codegen_flags: <defaults>
</compile_context>

<pallas_src>
import math

import jax
import jax.numpy as jnp
from jax.experimental import pallas as pl
from jax.experimental.pallas import tpu as pltpu

BN_EPS = 1e-5
LANE = 128


def _round_up(x, m):
    return ((x + m - 1) // m) * m


def _pick_tile(n, candidates, min_blocks=1):
    """Largest candidate dividing n that leaves >= min_blocks blocks (fallback: any divisor)."""
    for t in candidates:
        if n % t == 0 and n // t >= min_blocks:
            return t
    for t in candidates:
        if n % t == 0:
            return t
    return n


# --------------------------------------------------------------------------------------
# Fused GCN-layer kernel:
#   k loop   : acc[i,:] += A_raw[i, k-tile] @ ((dinv[k-tile] * X[k-tile]) @ W)
#   last k   : out[i,:]  = dinv[i] * acc[i,:] * scale + shift
# A_raw = A + I (normalization folded out, exact integer counts); scale/shift fuse the
# conv bias with the BatchNorm affine.
# --------------------------------------------------------------------------------------

def gcn_layer_kernel(a_ref, x_ref, w_ref, dinv_col_ref, dinv_row_ref,
                     scale_ref, shift_ref, o_ref, acc_ref):
    k = pl.program_id(1)

    @pl.when(k == 0)
    def _():
        acc_ref[...] = jnp.zeros_like(acc_ref)

    # Feature transform for this reduction tile (recomputed per row tile: MXU work that
    # sits in slack under the HBM-bound A stream).  dinv column scale applied on the VPU.
    x = x_ref[...].astype(jnp.float32) * dinv_col_ref[...]
    p = jnp.dot(x.astype(w_ref.dtype), w_ref[...], preferred_element_type=jnp.float32)

    acc_ref[...] += jnp.dot(a_ref[...], p.astype(a_ref.dtype),
                            preferred_element_type=jnp.float32)

    @pl.when(k == pl.num_programs(1) - 1)
    def _():
        o_ref[...] = (dinv_row_ref[...] * acc_ref[...] * scale_ref[...]
                      + shift_ref[...]).astype(o_ref.dtype)


# --------------------------------------------------------------------------------------
# pallas_call wrapper (one fused GCN layer)
# --------------------------------------------------------------------------------------

def gcn_layer(a_raw, x, w, dinv, scale, shift, *, tm, tk, out_dtype):
    """out = dinv_row * (A_raw @ ((dinv_col * X) @ W)) * scale + shift, one pallas_call."""
    n_pad = a_raw.shape[0]
    din = x.shape[1]
    f = w.shape[1]
    return pl.pallas_call(
        gcn_layer_kernel,
        out_shape=jax.ShapeDtypeStruct((n_pad, f), out_dtype),
        grid_spec=pltpu.PrefetchScalarGridSpec(
            num_scalar_prefetch=0,
            grid=(n_pad // tm, n_pad // tk),
            in_specs=[
                pl.BlockSpec((tm, tk), lambda i, k: (i, k)),    # A_raw tile (dominant stream)
                pl.BlockSpec((tk, din), lambda i, k: (k, 0)),   # X tile (natural width)
                pl.BlockSpec((din, f), lambda i, k: (0, 0)),    # W (resident)
                pl.BlockSpec((tk, 1), lambda i, k: (k, 0)),     # D^{-1/2} over contraction rows
                pl.BlockSpec((tm, 1), lambda i, k: (i, 0)),     # D^{-1/2} over output rows
                pl.BlockSpec((1, f), lambda i, k: (0, 0)),      # fused scale  (resident)
                pl.BlockSpec((1, f), lambda i, k: (0, 0)),      # fused shift  (resident)
            ],
            out_specs=pl.BlockSpec((tm, f), lambda i, k: (i, 0)),
            scratch_shapes=[pltpu.VMEM((tm, f), jnp.float32)],
        ),
        compiler_params=pltpu.CompilerParams(
            dimension_semantics=("parallel", "arbitrary")),
    )(a_raw, x, w, dinv, dinv, scale, shift)


# --------------------------------------------------------------------------------------
# Plain-JAX glue (data-dependent scatter) + forward
# --------------------------------------------------------------------------------------

def gcn_raw_adjacency(edge_index, num_nodes):
    """Raw (A + I) counts (rows = destination, cols = source) and D^{-1/2} (PyG gcn_norm)."""
    src, dst = edge_index[0], edge_index[1]
    loop = jnp.arange(num_nodes, dtype=src.dtype)
    src = jnp.concatenate([src, loop])
    dst = jnp.concatenate([dst, loop])
    a = jnp.zeros((num_nodes, num_nodes), jnp.float32).at[dst, src].add(1.0)
    deg = a.sum(axis=1)
    dinv = jnp.where(deg > 0, jax.lax.rsqrt(deg), 0.0)
    return a, dinv


def gcn_normalized_adjacency(edge_index, num_nodes):
    a, dinv = gcn_raw_adjacency(edge_index, num_nodes)
    return dinv[:, None] * a * dinv[None, :]


def _pad2(x, rows, cols):
    out = jnp.zeros((rows, cols), jnp.float32)
    return out.at[: x.shape[0], : x.shape[1]].set(x)


def graphnn_forward(edge_index, params, *, mxu_dtype=jnp.bfloat16):
    emb = params["embedding"]                       # (N, D)
    n, d = emb.shape
    hidden = params["w1"].shape[1]

    n_pad = _round_up(max(n, LANE), LANE)
    h_pad = _round_up(hidden, LANE)
    d_pad = _round_up(d, LANE)

    # Row tile keeps >= 2 blocks when possible (v7x megacore sharding of the parallel
    # axis); reduction tile is the largest candidate dividing n_pad.
    tm = _pick_tile(n_pad, (512, 256, 128), min_blocks=2)
    tk = _pick_tile(n_pad, (2048, 1024, 512, 256, 128))

    # Raw A + I (exact counts -> exact in bf16) + folded-out normalization vector.
    a_raw, dinv = gcn_raw_adjacency(edge_index, n)
    a_pad = _pad2(a_raw, n_pad, n_pad).astype(mxu_dtype)
    dinv_pad = _pad2(dinv[:, None], n_pad, 1)                  # f32 (n_pad, 1)

    # Layer-1 X keeps its natural feature width (no 8x zero-column inflation).
    x1 = _pad2(emb, n_pad, d).astype(mxu_dtype)                # (n_pad, 16)
    w1 = _pad2(params["w1"], d, h_pad).astype(mxu_dtype)       # (16, 128)
    w2 = _pad2(params["w2"], h_pad, d_pad).astype(mxu_dtype)   # (128, 128)

    ones_h = jnp.ones((1, h_pad), jnp.float32)
    b1_pad = _pad2(params["b1"], 1, h_pad)

    # Bias + BatchNorm folded into the epilogue:  out = dinv_i * acc * scale + shift.
    inv_std = jax.lax.rsqrt(params["bn_var"] + BN_EPS)
    bn_scale = params["bn_gamma"] * inv_std
    bn_shift = params["bn_beta"] - params["bn_mean"] * bn_scale
    scale2 = _pad2(bn_scale, 1, d_pad)
    shift2 = _pad2(params["b2"] * bn_scale + bn_shift, 1, d_pad)

    # --- GCN layer 1 (fused transform + aggregate); eval-mode dropout == identity. ---
    h1 = gcn_layer(a_pad, x1, w1, dinv_pad, ones_h, b1_pad,
                   tm=tm, tk=tk, out_dtype=mxu_dtype)

    # --- GCN layer 2 + fused bias + BatchNorm. ---
    out_pad = gcn_layer(a_pad, h1, w2, dinv_pad, scale2, shift2,
                        tm=tm, tk=tk, out_dtype=jnp.float32)

    return out_pad[:n, :d]


# --------------------------------------------------------------------------------------
# Parameter init + pure-JAX reference
# --------------------------------------------------------------------------------------

def init_params(key, num_nodes, input_dim):
    k_emb, k_w1, k_w2 = jax.random.split(key, 3)

    # nn.Embedding weight, xavier_normal_ (init_weights() overwrites the padding row too).
    emb_std = math.sqrt(2.0 / (num_nodes + input_dim))
    embedding = emb_std * jax.random.normal(k_emb, (num_nodes, input_dim), jnp.float32)

    def glorot_uniform(k, fan_in, fan_out):
        bound = math.sqrt(6.0 / (fan_in + fan_out))
        return jax.random.uniform(k, (fan_in, fan_out), jnp.float32, -bound, bound)

    hidden = input_dim * 2
    return {
        "embedding": embedding,
        "w1": glorot_uniform(k_w1, input_dim, hidden),
        "b1": jnp.zeros((1, hidden), jnp.float32),
        "w2": glorot_uniform(k_w2, hidden, input_dim),
        "b2": jnp.zeros((1, input_dim), jnp.float32),
        "bn_gamma": jnp.ones((1, input_dim), jnp.float32),
        "bn_beta": jnp.zeros((1, input_dim), jnp.float32),
        "bn_mean": jnp.zeros((1, input_dim), jnp.float32),
        "bn_var": jnp.ones((1, input_dim), jnp.float32),
    }


def reference_forward(edge_index, params):
    """Pure-JAX reference of the same eval-mode semantics."""
    a_hat = gcn_normalized_adjacency(edge_index, params["embedding"].shape[0])
    h1 = a_hat @ (params["embedding"] @ params["w1"]) + params["b1"]
    h2 = a_hat @ (h1 @ params["w2"]) + params["b2"]
    return (h2 - params["bn_mean"]) * jax.lax.rsqrt(params["bn_var"] + BN_EPS) \
        * params["bn_gamma"] + params["bn_beta"]


if __name__ == "__main__":
    num_nodes, input_dim, num_edges = 32, 16, 64

    key = jax.random.PRNGKey(0)
    k_params, k_src, k_dst = jax.random.split(key, 3)

    params = init_params(k_params, num_nodes, input_dim)
    edge_index = jnp.stack([
        jax.random.randint(k_src, (num_edges,), 0, num_nodes, jnp.int32),
        jax.random.randint(k_dst, (num_edges,), 0, num_nodes, jnp.int32),
    ])                                                    # (2, E), rows = [src, dst]

    ref = reference_forward(edge_index, params)

    # f32 everywhere (tight tolerance; validates the folded-normalization math).
    out_f32 = jax.block_until_ready(
        graphnn_forward(edge_index, params, mxu_dtype=jnp.float32))
    assert out_f32.shape == (num_nodes, input_dim)
    assert jnp.allclose(out_f32, ref, atol=1e-4, rtol=1e-4)

    # Default fast path: bf16 A / weights / activations (A entries exact in bf16),
    # f32 accumulation and f32 final output.
    out = jax.block_until_ready(graphnn_forward(edge_index, params))
    assert out.shape == (num_nodes, input_dim)
    assert jnp.allclose(out, ref, atol=2e-2, rtol=2e-2)

    print("KERNEL_OK")
</pallas_src>

<mosaic_0001>
module attributes {stable_mosaic.version = 11 : i64} {
  func.func @gcn_layer_kernel(%arg0: i32, %arg1: i32, %arg2: memref<128x128xf32, #tpu.memory_space<vmem>>, %arg3: memref<128x16xf32, #tpu.memory_space<vmem>>, %arg4: memref<16x128xf32, #tpu.memory_space<vmem>>, %arg5: memref<128x1xf32, #tpu.memory_space<vmem>>, %arg6: memref<128x1xf32, #tpu.memory_space<vmem>>, %arg7: memref<1x128xf32, #tpu.memory_space<vmem>>, %arg8: memref<1x128xf32, #tpu.memory_space<vmem>>, %arg9: memref<128x128xf32, #tpu.memory_space<vmem>>, %arg10: memref<128x128xf32, #tpu.memory_space<vmem>>) attributes {dimension_semantics = [#tpu.dimension_semantics<parallel>, #tpu.dimension_semantics<arbitrary>], iteration_bounds = array<i64: 1, 1>, scalar_prefetch = 0 : i64, scratch_operands = 1 : i64, tpu.core_type = #tpu.core_type<tc>, window_params = [{transform_indices = @transform_0, window_bounds = array<i64: 128, 128>}, {transform_indices = @transform_1, window_bounds = array<i64: 128, 16>}, {pipeline_mode = #tpu.pipeline_mode<synchronous>, transform_indices = @transform_2, window_bounds = array<i64: 16, 128>}, {transform_indices = @transform_3, window_bounds = array<i64: 128, 1>}, {transform_indices = @transform_4, window_bounds = array<i64: 128, 1>}, {pipeline_mode = #tpu.pipeline_mode<synchronous>, transform_indices = @transform_5, window_bounds = array<i64: 1, 128>}, {pipeline_mode = #tpu.pipeline_mode<synchronous>, transform_indices = @transform_6, window_bounds = array<i64: 1, 128>}, {transform_indices = @transform_7, window_bounds = array<i64: 128, 128>}]} {
    %c0_i32 = arith.constant 0 : i32
    %0 = arith.cmpi eq, %arg1, %c0_i32 : i32
    %1 = arith.extui %0 : i1 to i32
    %c0_i32_0 = arith.constant 0 : i32
    %2 = arith.cmpi ne, %1, %c0_i32_0 : i32
    scf.if %2 {
      %cst_15 = arith.constant 0.000000e+00 : f32
      %17 = vector.broadcast %cst_15 : f32 to vector<128x128xf32>
      %c0_16 = arith.constant 0 : index
      %c0_17 = arith.constant 0 : index
      %18 = vector.load %arg10[%c0_16, %c0_17] : memref<128x128xf32, #tpu.memory_space<vmem>>, vector<128x128xf32>
      tpu.vector_store %arg10[%c0_16, %c0_17], %17 {strides = array<i32>} : memref<128x128xf32, #tpu.memory_space<vmem>>, vector<128x128xf32>,
    } else {
    }
    %c0 = arith.constant 0 : index
    %c0_1 = arith.constant 0 : index
    %3 = vector.load %arg3[%c0, %c0_1] : memref<128x16xf32, #tpu.memory_space<vmem>>, vector<128x16xf32>
    %c0_2 = arith.constant 0 : index
    %c0_3 = arith.constant 0 : index
    %4 = vector.load %arg5[%c0_2, %c0_3] : memref<128x1xf32, #tpu.memory_space<vmem>>, vector<128x1xf32>
    %5 = vector.broadcast %4 : vector<128x1xf32> to vector<128x16xf32>
    %6 = arith.mulf %3, %5 : vector<128x16xf32>
    %c0_4 = arith.constant 0 : index
    %c0_5 = arith.constant 0 : index
    %7 = vector.load %arg4[%c0_4, %c0_5] : memref<16x128xf32, #tpu.memory_space<vmem>>, vector<16x128xf32>
    %cst = arith.constant dense<0.000000e+00> : vector<128x128xf32>
    %8 = tpu.matmul %6, %7, %cst {dimension_numbers = #tpu.dot_dimension_numbers<[1], [0], [0], [1], [0, 0, 1, 1], [], []>} : vector<128x16xf32>, vector<16x128xf32>, vector<128x128xf32> -> vector<128x128xf32>
    %c0_6 = arith.constant 0 : index
    %c0_7 = arith.constant 0 : index
    %9 = vector.load %arg10[%c0_6, %c0_7] : memref<128x128xf32, #tpu.memory_space<vmem>>, vector<128x128xf32>
    %c0_8 = arith.constant 0 : index
    %c0_9 = arith.constant 0 : index
    %10 = vector.load %arg2[%c0_8, %c0_9] : memref<128x128xf32, #tpu.memory_space<vmem>>, vector<128x128xf32>
    %cst_10 = arith.constant dense<0.000000e+00> : vector<128x128xf32>
    %11 = tpu.matmul %10, %8, %cst_10 {dimension_numbers = #tpu.dot_dimension_numbers<[1], [0], [0], [1], [0, 0, 1, 1], [], []>} : vector<128x128xf32>, vector<128x128xf32>, vector<128x128xf32> -> vector<128x128xf32>
    %12 = arith.addf %9, %11 : vector<128x128xf32>
    %c0_11 = arith.constant 0 : index
    %c0_12 = arith.constant 0 : index
    %13 = vector.load %arg10[%c0_11, %c0_12] : memref<128x128xf32, #tpu.memory_space<vmem>>, vector<128x128xf32>
    tpu.vector_store %arg10[%c0_11, %c0_12], %12 {strides = array<i32>} : memref<128x128xf32, #tpu.memory_space<vmem>>, vector<128x128xf32>,
    %c0_i32_13 = arith.constant 0 : i32
    %14 = arith.cmpi eq, %arg1, %c0_i32_13 : i32
    %15 = arith.extui %14 : i1 to i32
    %c0_i32_14 = arith.constant 0 : i32
    %16 = arith.cmpi ne, %15, %c0_i32_14 : i32
    scf.if %16 {
      %c0_15 = arith.constant 0 : index
      %c0_16 = arith.constant 0 : index
      %17 = vector.load %arg6[%c0_15, %c0_16] : memref<128x1xf32, #tpu.memory_space<vmem>>, vector<128x1xf32>
      %c0_17 = arith.constant 0 : index
      %c0_18 = arith.constant 0 : index
      %18 = vector.load %arg10[%c0_17, %c0_18] : memref<128x128xf32, #tpu.memory_space<vmem>>, vector<128x128xf32>
      %19 = vector.broadcast %17 : vector<128x1xf32> to vector<128x128xf32>
      %20 = arith.mulf %19, %18 : vector<128x128xf32>
      %c0_19 = arith.constant 0 : index
      %c0_20 = arith.constant 0 : index
      %21 = vector.load %arg7[%c0_19, %c0_20] : memref<1x128xf32, #tpu.memory_space<vmem>>, vector<1x128xf32>
      %22 = vector.broadcast %21 : vector<1x128xf32> to vector<128x128xf32>
      %23 = arith.mulf %20, %22 : vector<128x128xf32>
      %c0_21 = arith.constant 0 : index
      %c0_22 = arith.constant 0 : index
      %24 = vector.load %arg8[%c0_21, %c0_22] : memref<1x128xf32, #tpu.memory_space<vmem>>, vector<1x128xf32>
      %25 = vector.broadcast %24 : vector<1x128xf32> to vector<128x128xf32>
      %26 = arith.addf %23, %25 : vector<128x128xf32>
      %c0_23 = arith.constant 0 : index
      %c0_24 = arith.constant 0 : index
      %27 = vector.load %arg9[%c0_23, %c0_24] : memref<128x128xf32, #tpu.memory_space<vmem>>, vector<128x128xf32>
      tpu.vector_store %arg9[%c0_23, %c0_24], %26 {strides = array<i32>} : memref<128x128xf32, #tpu.memory_space<vmem>>, vector<128x128xf32>,
    } else {
    }
    return
  }
  func.func @transform_0(%arg0: i32, %arg1: i32) -> (i32, i32) {
    %c0_i32 = arith.constant 0 : i32
    return %arg0, %arg1 : i32, i32
  }
  func.func @transform_1(%arg0: i32, %arg1: i32) -> (i32, i32) {
    %c0_i32 = arith.constant 0 : i32
    %c0_i32_0 = arith.constant 0 : i32
    return %arg1, %c0_i32 : i32, i32
  }
  func.func @transform_2(%arg0: i32, %arg1: i32) -> (i32, i32) {
    %c0_i32 = arith.constant 0 : i32
    %c0_i32_0 = arith.constant 0 : i32
    %c0_i32_1 = arith.constant 0 : i32
    return %c0_i32, %c0_i32_0 : i32, i32
  }
  func.func @transform_3(%arg0: i32, %arg1: i32) -> (i32, i32) {
    %c0_i32 = arith.constant 0 : i32
    %c0_i32_0 = arith.constant 0 : i32
    return %arg1, %c0_i32 : i32, i32
  }
  func.func @transform_4(%arg0: i32, %arg1: i32) -> (i32, i32) {
    %c0_i32 = arith.constant 0 : i32
    %c0_i32_0 = arith.constant 0 : i32
    return %arg0, %c0_i32 : i32, i32
  }
  func.func @transform_5(%arg0: i32, %arg1: i32) -> (i32, i32) {
    %c0_i32 = arith.constant 0 : i32
    %c0_i32_0 = arith.constant 0 : i32
    %c0_i32_1 = arith.constant 0 : i32
    return %c0_i32, %c0_i32_0 : i32, i32
  }
  func.func @transform_6(%arg0: i32, %arg1: i32) -> (i32, i32) {
    %c0_i32 = arith.constant 0 : i32
    %c0_i32_0 = arith.constant 0 : i32
    %c0_i32_1 = arith.constant 0 : i32
    return %c0_i32, %c0_i32_0 : i32, i32
  }
  func.func @transform_7(%arg0: i32, %arg1: i32) -> (i32, i32) {
    %c0_i32 = arith.constant 0 : i32
    %c0_i32_0 = arith.constant 0 : i32
    return %arg0, %c0_i32 : i32, i32
  }
}

</mosaic_0001>

<bundles_post_ra>
// kernel: tpu_custom_call.1
= control target key start
LH: loop header
LB: loop body
LE: loop exit
PB: predicated region body
PF: predicated region fallthrough
CT: control target
= control target key end

     0   :  { %v1023_v2 = vmov 0   ;;  %s1335_s0 = inlined_call_operand.vmem [shape: f32[128,128], index: 0, kind: input, shape index: {}]   ;;  %s1336_s1 = inlined_call_operand.vmem [shape: f32[128,16], index: 1, kind: input, shape index: {}]   ;;  %s1337_s2 = inlined_call_operand.vmem [shape: f32[16,128], index: 2, kind: input, shape index: {}]   ;;  %s1338_s3 = inlined_call_operand.vmem [shape: f32[128,1], index: 3, kind: input, shape index: {}]   ;;  %s1339_s4 = inlined_call_operand.vmem [shape: f32[128,1], index: 4, kind: input, shape index: {}]   ;;  %s1340_s5 = inlined_call_operand.vmem [shape: f32[1,128], index: 5, kind: input, shape index: {}]   ;;  %s1341_s6 = inlined_call_operand.vmem [shape: f32[1,128], index: 6, kind: input, shape index: {}]   ;;  %s1342_s7 = inlined_call_operand.hbm [shape: f32[128,128], index: 7, kind: output, shape index: {}]  }
   0x1   :  { %v65_v0 = vld [vmem:[%s1338_s3 + $0x10] sm:$0xff]  ;;  %v63_v1 = vld [vmem:[%s1338_s3] sm:$0xff]  ;;  %998 = vset.pattern.permute.xlu1 %v1023_v2  ;;  %997 = vset.pattern.permute.xlu0 %v1023_v2  ;;  %v66_v3 = vld [vmem:[%s1338_s3 + $0x18] sm:$0xff] }
   0x2   :  { %91 = vperm.xlu1 %998, %v65_v0   ;;  %81 = vperm.xlu0 %997, %v63_v1   ;;  %v64_v4 = vld [vmem:[%s1338_s3 + $0x8] sm:$0xff]  ;;  %v67_v6 = vld [vmem:[%s1338_s3 + $0x20] sm:$0xff]  ;;  %v70_v7 = vld [vmem:[%s1338_s3 + $0x38] sm:$0xff] }
   0x3   :  { %v68_v5 = vld [vmem:[%s1338_s3 + $0x28] sm:$0xff]  ;;  %v69_v8 = vld [vmem:[%s1338_s3 + $0x30] sm:$0xff]  ;;  %v175_v9 = vld [vmem:[%s1337_s2] sm:$0xff] }
   0x4   :  { %v176_v10 = vld [vmem:[%s1337_s2 + $0x8] sm:$0xff] }
   0x5   :  { %v941_v11 = vpack.c.bf16 %v176_v10, %v175_v9 }
   0x6   :  { %96 = vperm.xlu1 %998, %v66_v3   ;;  %86 = vperm.xlu0 %997, %v64_v4  }
   0xa   :  { %106 = vperm.xlu1 %998, %v68_v5   ;;  %101 = vperm.xlu0 %997, %v67_v6  }
   0xe   :  { %116 = vperm.xlu1 %998, %v70_v7   ;;  %111 = vperm.xlu0 %997, %v69_v8  }
   0xf   :  { %12 = vsyncpa [#allocation4], 0  ;;  %v72_v12 = vld [vmem:[%s1338_s3 + $0x48] sm:$0xff]  ;;  %v71_v13 = vld [vmem:[%s1338_s3 + $0x40] sm:$0xff]  ;;  %942 = vmatprep.subr.bf16.mxu0 %v941_v11  ;;  %vm177_vm0 = vcmask 130048  }
  0x10   :  { %944 = vmatpush3.bf16.msra.mxu0 %v941_v11  ;;  %v74_v14 = vld [vmem:[%s1338_s3 + $0x58] sm:$0xff]  ;;  %v73_v15 = vld [vmem:[%s1338_s3 + $0x50] sm:$0xff]  ;;  %v76_v16 = vld [vmem:[%s1338_s3 + $0x68] sm:$0xff] }
  0x11   :  { %v75_v17 = vld [vmem:[%s1338_s3 + $0x60] sm:$0xff]  ;;  %v78_v18 = vld [vmem:[%s1338_s3 + $0x78] sm:$0xff]  ;;  %v77_v19 = vld [vmem:[%s1338_s3 + $0x70] sm:$0xff] }
  0x12   :  { %126 = vperm.xlu1 %998, %v72_v12   ;;  %121 = vperm.xlu0 %997, %v71_v13   ;;  %v584_v20 = vld [vmem:[%s1339_s4 + $0x8] sm:$0xff]  ;;  %v583_v21 = vld [vmem:[%s1339_s4] sm:$0xff]  ;;  %v586_v22 = vld [vmem:[%s1339_s4 + $0x18] sm:$0xff] }
  0x13   :  { %v585_v23 = vld [vmem:[%s1339_s4 + $0x10] sm:$0xff]  ;;  %v588_v24 = vld [vmem:[%s1339_s4 + $0x28] sm:$0xff]  ;;  %v587_v25 = vld [vmem:[%s1339_s4 + $0x20] sm:$0xff] }
  0x14   :  { %v590_v26 = vld [vmem:[%s1339_s4 + $0x38] sm:$0xff]  ;;  %v589_v27 = vld [vmem:[%s1339_s4 + $0x30] sm:$0xff]  ;;  %v592_v28 = vld [vmem:[%s1339_s4 + $0x48] sm:$0xff] }
  0x15   :  { %v591_v29 = vld [vmem:[%s1339_s4 + $0x40] sm:$0xff]  ;;  %v594_v30 = vld [vmem:[%s1339_s4 + $0x58] sm:$0xff]  ;;  %v593_v31 = vld [vmem:[%s1339_s4 + $0x50] sm:$0xff] }
  0x16   :  { %136 = vperm.xlu1 %998, %v74_v14   ;;  %131 = vperm.xlu0 %997, %v73_v15   ;;  %v596_v32 = vld [vmem:[%s1339_s4 + $0x68] sm:$0xff]  ;;  %v595_v33 = vld [vmem:[%s1339_s4 + $0x60] sm:$0xff]  ;;  %v598_v34 = vld [vmem:[%s1339_s4 + $0x78] sm:$0xff] }
  0x17   :  { %v597_v35 = vld [vmem:[%s1339_s4 + $0x70] sm:$0xff]  ;;  %v47_v36 = vld [vmem:[%s1336_s1] sm:$0xff]  ;;  %v48_v41 = vld [vmem:[%s1336_s1 + $0x8] sm:$0xff] }
  0x18   :  { %v49_v39 = vld [vmem:[%s1336_s1 + $0x10] sm:$0xff]  ;;  %v50_v46 = vld [vmem:[%s1336_s1 + $0x18] sm:$0xff]  ;;  %v51_v47 = vld [vmem:[%s1336_s1 + $0x20] sm:$0xff] }
  0x19   :  { %v52_v52 = vld [vmem:[%s1336_s1 + $0x28] sm:$0xff]  ;;  %v53_v53 = vld [vmem:[%s1336_s1 + $0x30] sm:$0xff]  ;;  %v54_v58 = vld [vmem:[%s1336_s1 + $0x38] sm:$0xff] }
  0x1a   :  { %146 = vperm.xlu1 %998, %v76_v16   ;;  %141 = vperm.xlu0 %997, %v75_v17   ;;  %v55_v59 = vld [vmem:[%s1336_s1 + $0x40] sm:$0xff]  ;;  %v56_v0 = vld [vmem:[%s1336_s1 + $0x48] sm:$0xff]  ;;  %v57_v1 = vld [vmem:[%s1336_s1 + $0x50] sm:$0xff] }
  0x1b   :  { %v58_v6 = vld [vmem:[%s1336_s1 + $0x58] sm:$0xff]  ;;  %v59_v7 = vld [vmem:[%s1336_s1 + $0x60] sm:$0xff]  ;;  %v60_v12 = vld [vmem:[%s1336_s1 + $0x68] sm:$0xff] }
  0x1c   :  { %v61_v13 = vld [vmem:[%s1336_s1 + $0x70] sm:$0xff] }
  0x1e   :  { %156 = vperm.xlu1 %998, %v78_v18   ;;  %151 = vperm.xlu0 %997, %v77_v19   ;;  %v62_v18 = vld [vmem:[%s1336_s1 + $0x78] sm:$0xff] }
  0x22   :  { %622 = vperm.xlu1 %998, %v584_v20   ;;  %617 = vperm.xlu0 %997, %v583_v21   ;;  %v387_v20 = vld [vmem:[%s1335_s0] sm:$0xff]  ;;  %v393_v21 = vld [vmem:[%s1335_s0 + $0x30] sm:$0xff] }
  0x23   :  { %926 = vmatprep.mubr.f32.mxu1 %v393_v21 }
  0x26   :  { %632 = vperm.xlu1 %998, %v586_v22   ;;  %627 = vperm.xlu0 %997, %v585_v23  }
  0x2a   :  { %642 = vperm.xlu1 %998, %v588_v24   ;;  %637 = vperm.xlu0 %997, %v587_v25  }
  0x2e   :  { %652 = vperm.xlu1 %998, %v590_v26   ;;  %647 = vperm.xlu0 %997, %v589_v27  }
  0x32   :  { %662 = vperm.xlu1 %998, %v592_v28   ;;  %657 = vperm.xlu0 %997, %v591_v29  }
  0x36   :  { %672 = vperm.xlu1 %998, %v594_v30   ;;  %667 = vperm.xlu0 %997, %v593_v31  }
  0x3a   :  { %682 = vperm.xlu1 %998, %v596_v32   ;;  %677 = vperm.xlu0 %997, %v595_v33  }
  0x3e   :  { %692 = vperm.xlu1 %998, %v598_v34   ;;  %687 = vperm.xlu0 %997, %v597_v35  }
  0x81   :  { %v92_v37 = vpop.permute.xlu1 %91  ;;  %v82_v38 = vpop.permute.xlu0 %81 }
  0x82   :  { %v159_v40 = vmul.f32 %v82_v38, %v47_v36  ;;  %v161_v42 = vmul.f32 %v92_v37, %v49_v39 }
  0x84   :  { %861 = vmatprep.mubr.msk.f32.mxu0 %vm177_vm0, %v159_v40 }
  0x85   :  { %v97_v43 = vpop.permute.xlu1 %96  ;;  %v87_v44 = vpop.permute.xlu0 %86 }
  0x86   :  { %v160_v45 = vmul.f32 %v87_v44, %v48_v41  ;;  %v162_v50 = vmul.f32 %v97_v43, %v50_v46  ;;  %v388_v46 = vld [vmem:[%s1335_s0 + $0x8] sm:$0xff] }
  0x88   :  { %862 = vmatmul.mubr.msk.f32.vlgmr.msra.gmra.mrb[0].mxu0 %vm177_vm0, %v160_v45 }
  0x89   :  { %v107_v48 = vpop.permute.xlu1 %106  ;;  %v102_v49 = vpop.permute.xlu0 %101  ;;  %864 = vmatprep.mubr.msk.f32.mxu0 %vm177_vm0, %v161_v42 }
  0x8a   :  { %v163_v51 = vmul.f32 %v102_v49, %v51_v47  ;;  %v164_v56 = vmul.f32 %v107_v48, %v52_v52  ;;  %v394_v47 = vld [vmem:[%s1335_s0 + $0x38] sm:$0xff]  ;;  %v389_v48 = vld [vmem:[%s1335_s0 + $0x10] sm:$0xff]  ;;  %v395_v49 = vld [vmem:[%s1335_s0 + $0x40] sm:$0xff] }
  0x8b   :  { %v391_v52 = vld [vmem:[%s1335_s0 + $0x20] sm:$0xff] }
  0x8c   :  { %865 = vmatmul.mubr.msk.f32.gmra.mrb[2].mxu0 %vm177_vm0, %v162_v50  ;;  %v390_v50 = vld [vmem:[%s1335_s0 + $0x18] sm:$0xff] }
  0x8d   :  { %v117_v54 = vpop.permute.xlu1 %116  ;;  %v112_v55 = vpop.permute.xlu0 %111  ;;  %867 = vmatprep.mubr.msk.f32.mxu0 %vm177_vm0, %v163_v51  ;;  %v396_v51 = vld [vmem:[%s1335_s0 + $0x48] sm:$0xff] }
  0x8e   :  { %v165_v57 = vmul.f32 %v112_v55, %v53_v53  ;;  %v166_v62 = vmul.f32 %v117_v54, %v54_v58  ;;  %v397_v53 = vld [vmem:[%s1335_s0 + $0x50] sm:$0xff]  ;;  %v392_v54 = vld [vmem:[%s1335_s0 + $0x28] sm:$0xff]  ;;  %v398_v55 = vld [vmem:[%s1335_s0 + $0x58] sm:$0xff] }
  0x8f   :  { %v401_v58 = vld [vmem:[%s1335_s0 + $0x70] sm:$0xff] }
  0x90   :  { %868 = vmatmul.mubr.msk.f32.gmra.mrb[4].mxu0 %vm177_vm0, %v164_v56  ;;  %v399_v56 = vld [vmem:[%s1335_s0 + $0x60] sm:$0xff] }
  0x91   :  { %v127_v60 = vpop.permute.xlu1 %126  ;;  %v122_v61 = vpop.permute.xlu0 %121  ;;  %870 = vmatprep.mubr.msk.f32.mxu0 %vm177_vm0, %v165_v57  ;;  %v400_v57 = vld [vmem:[%s1335_s0 + $0x68] sm:$0xff] }
  0x92   :  { %v167_v63 = vmul.f32 %v122_v61, %v55_v59  ;;  %v168_v4 = vmul.f32 %v127_v60, %v56_v0  ;;  %v402_v59 = vld [vmem:[%s1335_s0 + $0x78] sm:$0xff] }
  0x94   :  { %871 = vmatmul.mubr.msk.f32.gmra.mrb[6].mxu0 %vm177_vm0, %v166_v62 }
  0x95   :  { %v137_v2 = vpop.permute.xlu1 %136  ;;  %v132_v3 = vpop.permute.xlu0 %131  ;;  %873 = vmatprep.mubr.msk.f32.mxu0 %vm177_vm0, %v167_v63 }
  0x96   :  { %v169_v5 = vmul.f32 %v132_v3, %v57_v1  ;;  %v170_v10 = vmul.f32 %v137_v2, %v58_v6 }
  0x98   :  { %874 = vmatmul.mubr.msk.f32.gmra.mrb[8].mxu0 %vm177_vm0, %v168_v4 }
  0x99   :  { %v147_v8 = vpop.permute.xlu1 %146  ;;  %v142_v9 = vpop.permute.xlu0 %141  ;;  %876 = vmatprep.mubr.msk.f32.mxu0 %vm177_vm0, %v169_v5 }
  0x9a   :  { %v171_v11 = vmul.f32 %v142_v9, %v59_v7  ;;  %v172_v15 = vmul.f32 %v147_v8, %v60_v12  ;;  %v1284_v7 = vld [vmem:[%s1340_s5] ss:$0 sm:$0xff]  ;;  %s1024_s5 = smov [#allocation3]  }
  0x9c   :  { %877 = vmatmul.mubr.msk.f32.gmra.mrb[10].mxu0 %vm177_vm0, %v170_v10 }
  0x9d   :  { %v152_v14 = vpop.permute.xlu0 %151  ;;  %879 = vmatprep.mubr.msk.f32.mxu0 %vm177_vm0, %v171_v11  ;;  %v157_v17 = vpop.permute.xlu1 %156 }
  0x9e   :  { %v173_v16 = vmul.f32 %v152_v14, %v61_v13  ;;  %v174_v19 = vmul.f32 %v157_v17, %v62_v18  ;;  %v1289_v13 = vld [vmem:[%s1341_s6] ss:$0 sm:$0xff]  ;;  %s778_s6 = sshll.u32 %s1024_s5, 4  ;;  %s779_s6 = int_to_ptr.vmem [resolvable:$true] %s778_s6 }
  0x9f   :  { %s999_s30 = scalar_lea.vmem %s779_s6, 2048  ;;  %p1004_p1 = scmp.lt.s32.totalorder %s779_s6, %s779_s6 }
  0xa0   :  { %880 = vmatmul.mubr.msk.f32.gmra.mrb[12].mxu0 %vm177_vm0, %v172_v15  ;;  %p1000_p0 = scmp.ne.s32.totalorder %s779_s6, %s999_s30  ;;  %p1005_p2 = scmp.lt.s32.totalorder %s999_s30, %s999_s30 }
  0xa1   :  { %882 = vmatprep.mubr.msk.f32.mxu0 %vm177_vm0, %v173_v16  ;;  %v623_v60 = vpop.permute.xlu1 %622  ;;  %v618_v61 = vpop.permute.xlu0 %617 }
  0xa2   :  { %p1006_p3 = por %p1005_p2, %p1004_p1 }
  0xa4   :  { %883 = vmatmul.mubr.msk.f32.gmra.mrb[14].mxu0 %vm177_vm0, %v174_v19  ;;  %p1007_p4 = pnand %p1006_p3, %p1000_p0 }
  0xa5   :  { %917 = vmatprep.mubr.f32.mxu0 %v387_v20  ;;  %v633_v62 = vpop.permute.xlu1 %632  ;;  %v628_v63 = vpop.permute.xlu0 %627 }
  0xa9   :  { %v643_v0 = vpop.permute.xlu1 %642  ;;  %v638_v1 = vpop.permute.xlu0 %637 }
  0xad   :  { %v653_v2 = vpop.permute.xlu1 %652  ;;  %v648_v3 = vpop.permute.xlu0 %647 }
  0xb1   :  { %v663_v4 = vpop.permute.xlu1 %662  ;;  %v658_v5 = vpop.permute.xlu0 %657 }
  0xb5   :  { %v673_v16 = vpop.permute.xlu1 %672  ;;  %v668_v17 = vpop.permute.xlu0 %667 }
 0x15b   :  { %v863_v22 = vpop.f32.mrb[0].mxu0 }
 0x15c   :  { %v292_v23 = vpop.f32.mrb[1].mxu0 }
 0x15d   :  { %v945_v24 = vpack.c.bf16 %v863_v22, %v292_v23 }
 0x15f   :  { %v866_v25 = vpop.f32.mrb[2].mxu0  ;;  %946 = vmatprep.subr.bf16.mxu0 %v945_v24  ;;  %977 = vmatprep.subr.bf16.mxu1 %v945_v24 }
 0x160   :  { %v302_v26 = vpop.f32.mrb[3].mxu0  ;;  %948 = vmatpush3.bf16.msra.mxu0 %v945_v24  ;;  %985 = vmatpush3.bf16.msra.mxu1 %v945_v24 }
 0x161   :  { %v949_v27 = vpack.c.bf16 %v866_v25, %v302_v26 }
 0x163   :  { %v869_v28 = vpop.f32.mrb[4].mxu0  ;;  %950 = vmatprep.subr.bf16.mxu0 %v949_v27  ;;  %978 = vmatprep.subr.bf16.mxu1 %v949_v27 }
 0x164   :  { %v312_v29 = vpop.f32.mrb[5].mxu0  ;;  %952 = vmatpush3.bf16.msra.mxu0 %v949_v27  ;;  %986 = vmatpush3.bf16.msra.mxu1 %v949_v27 }
 0x165   :  { %v953_v30 = vpack.c.bf16 %v869_v28, %v312_v29 }
 0x167   :  { %v872_v31 = vpop.f32.mrb[6].mxu0  ;;  %954 = vmatprep.subr.bf16.mxu0 %v953_v30  ;;  %979 = vmatprep.subr.bf16.mxu1 %v953_v30 }
 0x168   :  { %v322_v32 = vpop.f32.mrb[7].mxu0  ;;  %956 = vmatpush3.bf16.msra.mxu0 %v953_v30  ;;  %987 = vmatpush3.bf16.msra.mxu1 %v953_v30 }
 0x169   :  { %v957_v33 = vpack.c.bf16 %v872_v31, %v322_v32 }
 0x16b   :  { %v875_v34 = vpop.f32.mrb[8].mxu0  ;;  %958 = vmatprep.subr.bf16.mxu0 %v957_v33  ;;  %980 = vmatprep.subr.bf16.mxu1 %v957_v33 }
 0x16c   :  { %v332_v35 = vpop.f32.mrb[9].mxu0  ;;  %960 = vmatpush3.bf16.msra.mxu0 %v957_v33  ;;  %988 = vmatpush3.bf16.msra.mxu1 %v957_v33 }
 0x16d   :  { %v961_v36 = vpack.c.bf16 %v875_v34, %v332_v35 }
 0x16f   :  { %v878_v37 = vpop.f32.mrb[10].mxu0  ;;  %962 = vmatprep.subr.bf16.mxu0 %v961_v36  ;;  %981 = vmatprep.subr.bf16.mxu1 %v961_v36 }
 0x170   :  { %v342_v38 = vpop.f32.mrb[11].mxu0  ;;  %964 = vmatpush3.bf16.msra.mxu0 %v961_v36  ;;  %989 = vmatpush3.bf16.msra.mxu1 %v961_v36 }
 0x171   :  { %v965_v39 = vpack.c.bf16 %v878_v37, %v342_v38 }
 0x173   :  { %v881_v40 = vpop.f32.mrb[12].mxu0  ;;  %966 = vmatprep.subr.bf16.mxu0 %v965_v39  ;;  %982 = vmatprep.subr.bf16.mxu1 %v965_v39 }
 0x174   :  { %v352_v41 = vpop.f32.mrb[13].mxu0  ;;  %968 = vmatpush3.bf16.msra.mxu0 %v965_v39  ;;  %990 = vmatpush3.bf16.msra.mxu1 %v965_v39 }
 0x175   :  { %v969_v42 = vpack.c.bf16 %v881_v40, %v352_v41 }
 0x177   :  { %v884_v43 = vpop.f32.mrb[14].mxu0  ;;  %970 = vmatprep.subr.bf16.mxu0 %v969_v42  ;;  %983 = vmatprep.subr.bf16.mxu1 %v969_v42 }
 0x178   :  { %v362_v44 = vpop.f32.mrb[15].mxu0  ;;  %972 = vmatpush3.bf16.msra.mxu0 %v969_v42  ;;  %991 = vmatpush3.bf16.msra.mxu1 %v969_v42 }
 0x179   :  { %v973_v45 = vpack.c.bf16 %v884_v43, %v362_v44 }
 0x17b   :  { %974 = vmatprep.subr.bf16.mxu0 %v973_v45  ;;  %984 = vmatprep.subr.bf16.mxu1 %v973_v45 }
 0x17c   :  { %976 = vmatpush3.bf16.msra.mxu0 %v973_v45  ;;  %992 = vmatpush3.bf16.msra.mxu1 %v973_v45 }
 0x17f   :  { %918 = vmatmul.mubr.f32.vlgmr.msra.gmra.mrb[16].mxu0 %v388_v46  ;;  %927 = vmatmul.mubr.f32.vlgmr.msra.gmra.mrb[0].mxu1 %v394_v47  ;;  %v683_v46 = vpop.permute.xlu1 %682 }
 0x180   :  { %920 = vmatprep.mubr.f32.mxu0 %v389_v48  ;;  %929 = vmatprep.mubr.f32.mxu1 %v395_v49 }
 0x183   :  { %921 = vmatmul.mubr.f32.gmra.mrb[18].mxu0 %v390_v50  ;;  %930 = vmatmul.mubr.f32.gmra.mrb[2].mxu1 %v396_v51  ;;  %v678_v51 = vpop.permute.xlu0 %677 }
 0x184   :  { %923 = vmatprep.mubr.f32.mxu0 %v391_v52  ;;  %932 = vmatprep.mubr.f32.mxu1 %v397_v53 }
 0x187   :  { %924 = vmatmul.mubr.f32.gmra.mrb[20].mxu0 %v392_v54  ;;  %933 = vmatmul.mubr.f32.gmra.mrb[4].mxu1 %v398_v55 }
 0x188   :  { %935 = vmatprep.mubr.f32.mxu1 %v399_v56 }
 0x18b   :  { %936 = vmatmul.mubr.f32.gmra.mrb[6].mxu1 %v400_v57 }
 0x18c   :  { %938 = vmatprep.mubr.f32.mxu1 %v401_v58 }
 0x18f   :  { %939 = vmatmul.mubr.f32.gmra.mrb[8].mxu1 %v402_v59 }
 0x252   :  { %v919_v6 = vpop.f32.mrb[16].mxu0  ;;  %v928_v8 = vpop.f32.mrb[0].mxu1 }
 0x253   :  { %v696_v9 = vmul.f32 %v919_v6, %v623_v60  ;;  %v702_v10 = vmul.f32 %v928_v8, %v653_v2  ;;  %v469_v11 = vpop.f32.mrb[17].mxu0  ;;  %v499_v12 = vpop.f32.mrb[1].mxu1 }
 0x254   :  { %v695_v14 = vmul.f32 %v618_v61, %v469_v11  ;;  %v701_v15 = vmul.f32 %v648_v3, %v499_v12 }
 0x255   :  { %v719_v18 = vmul.f32 %v1284_v7, %v696_v9  ;;  %v725_v19 = vmul.f32 %v1284_v7, %v702_v10 }
 0x256   :  { %v718_v20 = vmul.f32 %v1284_v7, %v695_v14  ;;  %v724_v21 = vmul.f32 %v1284_v7, %v701_v15  ;;  %v922_v22 = vpop.f32.mrb[18].mxu0  ;;  %v931_v23 = vpop.f32.mrb[2].mxu1 }
 0x257   :  { %v742_v24 = vadd.f32 %v1289_v13, %v719_v18  ;;  %v748_v25 = vadd.f32 %v1289_v13, %v725_v19  ;;  %v698_v26 = vmul.f32 %v922_v22, %v633_v62  ;;  %v704_v27 = vmul.f32 %v931_v23, %v663_v4  ;;  %v479_v28 = vpop.f32.mrb[19].mxu0  ;;  %v509_v29 = vpop.f32.mrb[3].mxu1 }
 0x258   :  { %v741_v30 = vadd.f32 %v1289_v13, %v718_v20  ;;  %v747_v31 = vadd.f32 %v1289_v13, %v724_v21  ;;  %v697_v32 = vmul.f32 %v628_v63, %v479_v28  ;;  %v703_v33 = vmul.f32 %v658_v5, %v509_v29  ;;  %v688_v4 = vpop.permute.xlu0 %687 }
 0x259   :  { %758 = vst [vmem:[#allocation3 + $0x8] sm:$0xff] %v742_v24  ;;  %764 = vst [vmem:[#allocation3 + $0x38] sm:$0xff] %v748_v25  ;;  %v721_v34 = vmul.f32 %v1284_v7, %v698_v26  ;;  %v727_v35 = vmul.f32 %v1284_v7, %v704_v27 }
 0x25a   :  { %757 = vst [vmem:[#allocation3] sm:$0xff] %v741_v30  ;;  %763 = vst [vmem:[#allocation3 + $0x30] sm:$0xff] %v747_v31  ;;  %v720_v36 = vmul.f32 %v1284_v7, %v697_v32  ;;  %v726_v37 = vmul.f32 %v1284_v7, %v703_v33  ;;  %v925_v38 = vpop.f32.mrb[20].mxu0  ;;  %v934_v39 = vpop.f32.mrb[4].mxu1 }
 0x25b   :  { %v744_v40 = vadd.f32 %v1289_v13, %v721_v34  ;;  %v750_v41 = vadd.f32 %v1289_v13, %v727_v35  ;;  %v700_v42 = vmul.f32 %v925_v38, %v643_v0  ;;  %v706_v43 = vmul.f32 %v934_v39, %v673_v16  ;;  %v489_v44 = vpop.f32.mrb[21].mxu0  ;;  %v519_v45 = vpop.f32.mrb[5].mxu1 }
 0x25c   :  { %v743_v47 = vadd.f32 %v1289_v13, %v720_v36  ;;  %v749_v48 = vadd.f32 %v1289_v13, %v726_v37  ;;  %v699_v49 = vmul.f32 %v638_v1, %v489_v44  ;;  %v705_v50 = vmul.f32 %v668_v17, %v519_v45  ;;  %v693_v1 = vpop.permute.xlu1 %692 }
 0x25d   :  { %760 = vst [vmem:[#allocation3 + $0x18] sm:$0xff] %v744_v40  ;;  %766 = vst [vmem:[#allocation3 + $0x48] sm:$0xff] %v750_v41  ;;  %v723_v52 = vmul.f32 %v1284_v7, %v700_v42  ;;  %v729_v53 = vmul.f32 %v1284_v7, %v706_v43 }
 0x25e   :  { %759 = vst [vmem:[#allocation3 + $0x10] sm:$0xff] %v743_v47  ;;  %765 = vst [vmem:[#allocation3 + $0x40] sm:$0xff] %v749_v48  ;;  %v722_v54 = vmul.f32 %v1284_v7, %v699_v49  ;;  %v728_v55 = vmul.f32 %v1284_v7, %v705_v50  ;;  %v937_v56 = vpop.f32.mrb[6].mxu1 }
 0x25f   :  { %v746_v57 = vadd.f32 %v1289_v13, %v723_v52  ;;  %v752_v58 = vadd.f32 %v1289_v13, %v729_v53  ;;  %v708_v59 = vmul.f32 %v937_v56, %v683_v46  ;;  %v529_v60 = vpop.f32.mrb[7].mxu1 }
 0x260   :  { %v745_v61 = vadd.f32 %v1289_v13, %v722_v54  ;;  %v751_v62 = vadd.f32 %v1289_v13, %v728_v55  ;;  %v707_v63 = vmul.f32 %v678_v51, %v529_v60 }
 0x261   :  { %762 = vst [vmem:[#allocation3 + $0x28] sm:$0xff] %v746_v57  ;;  %768 = vst [vmem:[#allocation3 + $0x58] sm:$0xff] %v752_v58  ;;  %v731_v0 = vmul.f32 %v1284_v7, %v708_v59 }
 0x262   :  { %761 = vst [vmem:[#allocation3 + $0x20] sm:$0xff] %v745_v61  ;;  %767 = vst [vmem:[#allocation3 + $0x50] sm:$0xff] %v751_v62  ;;  %v730_v2 = vmul.f32 %v1284_v7, %v707_v63  ;;  %v940_v3 = vpop.f32.mrb[8].mxu1 }
 0x263   :  { %v754_v5 = vadd.f32 %v1289_v13, %v731_v0  ;;  %v710_v6 = vmul.f32 %v940_v3, %v693_v1  ;;  %v539_v8 = vpop.f32.mrb[9].mxu1 }
 0x264   :  { %v753_v9 = vadd.f32 %v1289_v13, %v730_v2  ;;  %v709_v10 = vmul.f32 %v688_v4, %v539_v8 }
 0x265   :  { %770 = vst [vmem:[#allocation3 + $0x68] sm:$0xff] %v754_v5  ;;  %v733_v11 = vmul.f32 %v1284_v7, %v710_v6 }
 0x266   :  { %769 = vst [vmem:[#allocation3 + $0x60] sm:$0xff] %v753_v9  ;;  %v732_v12 = vmul.f32 %v1284_v7, %v709_v10 }
 0x267   :  { %v756_v14 = vadd.f32 %v1289_v13, %v733_v11 }
 0x268   :  { %v755_v15 = vadd.f32 %v1289_v13, %v732_v12 }
 0x269   :  { %772 = vst [vmem:[#allocation3 + $0x78] sm:$0xff] %v756_v14 }
 0x26a   :  { %771 = vst [vmem:[#allocation3 + $0x70] sm:$0xff] %v755_v15 }
 0x26b   :  { %1010 = shalt.err (!%p1007_p4)
}
 0x26c   :  { %s1011_s10 = scalar_lea.hbm %s1342_s7, 2048 }
 0x26d   :  { %p1012_p5 = scmp.ne.s32.totalorder %s1342_s7, %s1011_s10  ;;  %p1015_p6 = scmp.lt.u32.totalorder %s1011_s10, %s1342_s7 }
 0x26f   :  { %p1017_p7 = pnand %p1015_p6, %p1012_p5 }
 0x271   :  { %1020 = shalt.err (!%p1017_p7)
}
 0x272   :  { %s1025_s15 = smov 128   ;;  %s1026_s16 = smov 8  }
 0x273   :  { %784 = dma.vmem_to_hbm [thread:$0]  %s779_s6, 2048, %s1342_s7, [#allocation4], %s1025_s15, %s1025_s15, %s1026_s16  }
 0x274   :  { %1021 = dma.done.wait [#allocation4], 2048  }
 0x275   :  { %1022 = vsyncadd [#allocation4], 4294965248 }
 0x276   :  { %788 = vsyncpa [#allocation4], 1 }

</bundles_post_ra>
